<compile_context>
chip_gen: v7x
topology: tpu7x:2x2x1
jax: 0.10.0
libtpu: 0.0.40
codegen_flags: <defaults>
</compile_context>

<pallas_src>
import functools

import jax
import jax.numpy as jnp
from jax.experimental import pallas as pl
from jax.experimental.pallas import tpu as pltpu


def sap_kernel(x_ref, w_ref, o_ref, *, n_valid):
    # x_ref: (BN, T, H) VMEM; w_ref: (1, H) VMEM (lane-dense, resident); o_ref: (BN, H)
    bn, t, h = x_ref.shape
    x = x_ref[...].astype(jnp.float32)                       # (BN, T, H)
    w = w_ref[...].astype(jnp.float32)                       # (1, H)

    # --- attention logits: VPU multiply + lane (H) reduce, stays (BN, T, 1) ----
    logits = jnp.sum(x * w[None, :, :], axis=-1, keepdims=True)   # (BN, T, 1)

    # Partial last block: rows >= n_valid hold garbage; zero their logits so
    # exp stays finite. (Their outputs are dropped by the masked edge store.)
    if n_valid % bn != 0:
        row = (pl.program_id(0) * bn
               + jax.lax.broadcasted_iota(jnp.int32, (bn, t, 1), 0))
        logits = jnp.where(row < n_valid, logits, 0.0)

    # --- numerically stable softmax over T (axis=1, sublane reduce) ------------
    m = jnp.max(logits, axis=1, keepdims=True)                # (BN, 1, 1)
    e = jnp.exp(logits - m)                                   # (BN, T, 1)
    denom = jnp.sum(e, axis=1, keepdims=True)                 # (BN, 1, 1)
    att = e / denom                                           # exact normalization

    # --- weighted sum over T: VPU multiply + sublane reduce --------------------
    out = jnp.sum(att * x, axis=1)                            # (BN, H)
    o_ref[...] = out.astype(o_ref.dtype)


def self_attention_pooling(x, w, b=None, *, block_n=None):
    """x: (N, T, H); w: (1, H) = nn.Linear(H, 1).weight; b = scalar bias.

    Returns (N, H) = sum_T(softmax_T(x @ w.T + b) * x).

    The scalar bias shifts every logit of a row equally and softmax is
    shift-invariant, so it is mathematically a no-op and never enters the kernel.
    """
    del b  # softmax shift-invariance: bias cancels exactly.
    N, T, H = x.shape
    itemsize = x.dtype.itemsize
    row_bytes = T * H * itemsize

    # ~4 MiB x block (amortizes per-grid-step overhead, near HBM roofline),
    # capped so v7x's two TensorCores both get work, rounded to 8 rows.
    if block_n is None:
        block_n = max(8, min(1024, (4 << 20) // max(row_bytes, 1)))
        if N >= 16:
            block_n = min(block_n, max(8, N // 2))
    block_n = int(block_n)
    if block_n >= N:
        block_n = N                                   # single full block, no alignment need
    else:
        block_n = max(8, (block_n // 8) * 8)          # sublane-aligned output rows
        if block_n >= N:
            block_n = N

    grid = (pl.cdiv(N, block_n),)

    # VMEM budget: double-buffered x block + output block + resident weight + slack.
    x_block_bytes = block_n * T * H * itemsize
    out_block_bytes = block_n * H * itemsize
    vmem_limit = int(min(48 << 20,
                         max(16 << 20, 2 * x_block_bytes + 2 * out_block_bytes + (4 << 20))))

    w_row = jnp.asarray(w, x.dtype).reshape(1, H)     # lane-dense weight row

    flops = 4 * N * T * H                             # two mul+add passes over (N, T, H)
    bytes_accessed = x.size * itemsize + N * H * itemsize + H * itemsize

    kernel = functools.partial(sap_kernel, n_valid=N)

    return pl.pallas_call(
        kernel,
        out_shape=jax.ShapeDtypeStruct((N, H), x.dtype),
        grid=grid,
        in_specs=[
            pl.BlockSpec((block_n, T, H), lambda n: (n, 0, 0)),
            pl.BlockSpec((1, H), lambda n: (0, 0)),   # resident weight row
        ],
        out_specs=pl.BlockSpec((block_n, H), lambda n: (n, 0)),  # lane-dense output
        compiler_params=pltpu.CompilerParams(
            dimension_semantics=("parallel",),
            vmem_limit_bytes=vmem_limit,
        ),
        cost_estimate=pl.CostEstimate(
            flops=int(flops),
            transcendentals=int(N * T),
            bytes_accessed=int(bytes_accessed),
        ),
    )(x, w_row)


def reference(x, w, b):
    scores = jnp.einsum('nth,oh->nt', x, w) + jnp.asarray(b).reshape(1, 1)  # (N, T)
    att = jax.nn.softmax(scores, axis=-1)[..., None]                        # (N, T, 1)
    return jnp.sum(x * att, axis=1)                                         # (N, H)


if __name__ == "__main__":
    key = jax.random.PRNGKey(0)
    kx, kw, kb, kx2 = jax.random.split(key, 4)

    # Config 1: lane-dense H=128, N divisible by the block (2 grid steps of 8 rows).
    N, T, H = 16, 16, 128
    x = jax.random.normal(kx, (N, T, H), dtype=jnp.float32)
    bound = 1.0 / (H ** 0.5)   # mimic nn.Linear(H, 1) init
    w = jax.random.uniform(kw, (1, H), minval=-bound, maxval=bound, dtype=jnp.float32)
    b = jax.random.uniform(kb, (1,), minval=-bound, maxval=bound, dtype=jnp.float32)

    out = self_attention_pooling(x, w, b)
    jax.block_until_ready(out)
    ref = reference(x, w, b)
    assert out.shape == (N, H)
    assert jnp.allclose(out, ref, atol=1e-4, rtol=1e-4), \
        float(jnp.max(jnp.abs(out - ref)))

    # Config 2: ragged N (exercises the masked partial last block), small H.
    N2, T2, H2 = 20, 8, 32
    x2 = jax.random.normal(kx2, (N2, T2, H2), dtype=jnp.float32)
    w2 = w[:, :H2]
    out2 = self_attention_pooling(x2, w2, b)
    jax.block_until_ready(out2)
    ref2 = reference(x2, w2, b)
    assert out2.shape == (N2, H2)
    assert jnp.allclose(out2, ref2, atol=1e-4, rtol=1e-4), \
        float(jnp.max(jnp.abs(out2 - ref2)))

    print("KERNEL_OK")
</pallas_src>

<mosaic_0001>
module attributes {stable_mosaic.version = 11 : i64} {
  func.func @sap_kernel(%arg0: i32, %arg1: memref<8x16x128xf32, #tpu.memory_space<vmem>>, %arg2: memref<1x128xf32, #tpu.memory_space<vmem>>, %arg3: memref<8x128xf32, #tpu.memory_space<vmem>>) attributes {dimension_semantics = [#tpu.dimension_semantics<parallel>], iteration_bounds = array<i64: 2>, scalar_prefetch = 0 : i64, scratch_operands = 0 : i64, tpu.core_type = #tpu.core_type<tc>, window_params = [{transform_indices = @transform_0, window_bounds = array<i64: 8, 16, 128>}, {pipeline_mode = #tpu.pipeline_mode<synchronous>, transform_indices = @transform_1, window_bounds = array<i64: 1, 128>}, {transform_indices = @transform_2, window_bounds = array<i64: 8, 128>}]} {
    %c0 = arith.constant 0 : index
    %c0_0 = arith.constant 0 : index
    %c0_1 = arith.constant 0 : index
    %0 = vector.load %arg1[%c0, %c0_0, %c0_1] : memref<8x16x128xf32, #tpu.memory_space<vmem>>, vector<8x16x128xf32>
    %c0_2 = arith.constant 0 : index
    %c0_3 = arith.constant 0 : index
    %1 = vector.load %arg2[%c0_2, %c0_3] : memref<1x128xf32, #tpu.memory_space<vmem>>, vector<1x128xf32>
    %2 = vector.shape_cast %1 : vector<1x128xf32> to vector<1x1x128xf32>
    %3 = vector.broadcast %2 : vector<1x1x128xf32> to vector<8x16x128xf32>
    %4 = arith.mulf %0, %3 : vector<8x16x128xf32>
    %cst = arith.constant dense<0.000000e+00> : vector<8x16xf32>
    %5 = vector.multi_reduction <add>, %4, %cst [2] : vector<8x16x128xf32> to vector<8x16xf32>
    %6 = vector.shape_cast %5 : vector<8x16xf32> to vector<8x16x1xf32>
    %cst_4 = arith.constant dense<0xFF800000> : vector<8x1xf32>
    %7 = vector.multi_reduction <maximumf>, %6, %cst_4 [1] : vector<8x16x1xf32> to vector<8x1xf32>
    %8 = vector.shape_cast %7 : vector<8x1xf32> to vector<8x1x1xf32>
    %9 = vector.broadcast %8 : vector<8x1x1xf32> to vector<8x16x1xf32>
    %10 = arith.subf %6, %9 : vector<8x16x1xf32>
    %11 = math.exp %10 : vector<8x16x1xf32>
    %cst_5 = arith.constant dense<0.000000e+00> : vector<8x1xf32>
    %12 = vector.multi_reduction <add>, %11, %cst_5 [1] : vector<8x16x1xf32> to vector<8x1xf32>
    %13 = vector.shape_cast %12 : vector<8x1xf32> to vector<8x1x1xf32>
    %14 = vector.broadcast %13 : vector<8x1x1xf32> to vector<8x16x1xf32>
    %15 = arith.divf %11, %14 : vector<8x16x1xf32>
    %16 = vector.broadcast %15 : vector<8x16x1xf32> to vector<8x16x128xf32>
    %17 = arith.mulf %16, %0 : vector<8x16x128xf32>
    %cst_6 = arith.constant dense<0.000000e+00> : vector<8x128xf32>
    %18 = vector.multi_reduction <add>, %17, %cst_6 [1] : vector<8x16x128xf32> to vector<8x128xf32>
    %c0_7 = arith.constant 0 : index
    %c0_8 = arith.constant 0 : index
    %19 = vector.load %arg3[%c0_7, %c0_8] : memref<8x128xf32, #tpu.memory_space<vmem>>, vector<8x128xf32>
    tpu.vector_store %arg3[%c0_7, %c0_8], %18 {strides = array<i32>} : memref<8x128xf32, #tpu.memory_space<vmem>>, vector<8x128xf32>,
    return
  }
  func.func @transform_0(%arg0: i32) -> (i32, i32, i32) {
    %c0_i32 = arith.constant 0 : i32
    %c0_i32_0 = arith.constant 0 : i32
    %c0_i32_1 = arith.constant 0 : i32
    return %arg0, %c0_i32, %c0_i32_0 : i32, i32, i32
  }
  func.func @transform_1(%arg0: i32) -> (i32, i32) {
    %c0_i32 = arith.constant 0 : i32
    %c0_i32_0 = arith.constant 0 : i32
    %c0_i32_1 = arith.constant 0 : i32
    return %c0_i32, %c0_i32_0 : i32, i32
  }
  func.func @transform_2(%arg0: i32) -> (i32, i32) {
    %c0_i32 = arith.constant 0 : i32
    %c0_i32_0 = arith.constant 0 : i32
    return %arg0, %c0_i32 : i32, i32
  }
}

</mosaic_0001>

<bundles_post_ra>
// kernel: tpu_custom_call.1
= control target key start
LH: loop header
LB: loop body
LE: loop exit
PB: predicated region body
PF: predicated region fallthrough
CT: control target
= control target key end

     0   :  { %7 = vsyncpa [#allocation3], 0  ;;  %s1175_s0 = inlined_call_operand.hbm [shape: f32[16,16,128], index: 0, kind: input, shape index: {}]   ;;  %s1176_s1 = inlined_call_operand.vmem [shape: f32[1,128], index: 1, kind: input, shape index: {}]   ;;  %s1177_s2 = inlined_call_operand.hbm [shape: f32[16,128], index: 2, kind: output, shape index: {}]  }
   0x1   :  { %9 = vsyncpa [#allocation3 + $0x1], 0 }
   0x2   :  { %10 = vsyncpa [#allocation4], 0 }
   0x3   :  { %12 = vsyncpa [#allocation4 + $0x1], 0  ;;  %s829_s9 = smov 0   ;;  %s831_s10 = smov 0  }
   0x4   :  { %s833_s11 = smov 0   ;;  %s835_s12 = smov 0  }
   0x5 LB: > { %s850_s13 = sadd.s32 4294967295, %s808_s12   ;;  %s599_s14 = sadd.s32 4294967294, %s808_s12   ;;  %s808_s12 = sphi %s835_s12, %s1190_s12   ;;  %s804_s11 = sphi %s833_s11, %s1189_s11   ;;  %s800_s10 = sphi %s831_s10, %s1188_s10   ;;  %s796_s9 = sphi %s829_s9, %s1187_s9  }
   0x6   : > { %s854_s15 = sadd.s32 1, %s808_s12   ;;  %s25_s16 = sadd.s32 1, %s804_s11 }
   0x7   : > { %s22_s17 = ssub.s32 %s808_s12, %s854_s15  ;;  %p32_p0 = scmp.ne.s32.totalorder %s804_s11, %s800_s10 }
   0x8   : > { %p23_p1 = scmp.eq.s32.totalorder %s22_s17, 0  ;;  %p33_p2 = scmp.eq.s32.totalorder %s808_s12, 0 }
   0x9   : > { %p38_p3 = scmp.ne.s32.totalorder %s800_s10, %s796_s9  ;;  %p39_p4 = scmp.eq.s32.totalorder %s850_s13, 0 }
   0xa   : > { %s866_s18 = scalar_select %p23_p1, %s804_s11, %s25_s16  }
   0xb   : > { %p868_p5 = por %p33_p2, %p32_p0  ;;  %p872_p6 = por %p39_p4, %p38_p3 }
   0xc   : > { %p83_p7 = scmp.eq.s32.totalorder %s850_s13, 1  ;;  %p89_p8 = scmp.eq.s32.totalorder %s599_s14, 1 }
   0xd   : > { %p628_p10 = scmp.lt.s32.totalorder %s808_s12, 2  ;;  %s112_s23 = sand.u32 1, %s804_s11  }
   0xe   : > { %p879_p11 = por %p83_p7, %p32_p0  ;;  %p883_p12 = por %p89_p8, %p38_p3 }
   0xf   : > { %s615_s24 = sshll.u32 %s808_s12, 11  ;;  %s602_s25 = sshll.u32 %s112_s23, 7 }
  0x10   : > { %s1181_s21 = scalar_select %p879_p11, 1, 0 }
  0x11   : > { %s1182_s22 = scalar_select %p883_p12, 1, 0 }
  0x12   : > { %s892_s28 = scalar_lea.hbm %s1175_s0, %s615_s24  ;;  %s116_s29 = scalar_lea.vmem [#allocation2], %s602_s25 }
  0x13   : > { %s124_s30 = sshll.u32 %s116_s29, 4  ;;  %p896_p13 = pnand %p628_p10, %p868_p5  ;;  %s900_s30 = int_to_ptr.vmem [resolvable:$true] %s124_s30 }
  0x14   : > { %s902_s4 = scalar_lea.sflag [#allocation3], %s112_s23  ;;  %s712_s5 = scalar_lea.hbm %s892_s28, 2048 }
  0x15   : > { %p713_p0 = scmp.ne.s32.totalorder %s892_s28, %s712_s5  ;;  %p714_p1 = pneg %p896_p13 }
  0x16   : > { %s717_s8 = scalar_lea.hbm %s1175_s0, 4096  ;;  %p718_p4 = scmp.lt.u32.totalorder %s892_s28, %s1175_s0 }
  0x17   : > { %p715_p2 = pnand %p714_p1, %p713_p0  ;;  %p719_p5 = scmp.lt.u32.totalorder %s717_s8, %s712_s5 }
  0x18   : > { %p721_p8 = scmp.lt.u32.totalorder %s712_s5, %s892_s28 }
  0x19   : > { %p716_p3 = pneg %p715_p2  ;;  %p720_p7 = por %p719_p5, %p718_p4 }
  0x1b   : > { %p722_p10 = por %p721_p8, %p720_p7 }
  0x1d   : > { %p723_p9 = pnand %p722_p10, %p716_p3 }
  0x1f   : > { %726 = shalt.err (!%p723_p9)
}
  0x20   : > { %s727_s17 = scalar_lea.vmem %s900_s30, 2048  ;;  %s810_s19 = smov [#allocation2]  }
  0x21   : > { %p728_p0 = scmp.ne.s32.totalorder %s900_s30, %s727_s17  ;;  %s732_s23 = sshll.u32 %s810_s19, 4  ;;  %s733_s23 = int_to_ptr.vmem [resolvable:$false] %s732_s23 }
  0x22   : > { %s734_s24 = scalar_lea.vmem %s733_s23, 4096  ;;  %p735_p11 = scmp.lt.s32.totalorder %s900_s30, %s733_s23 }
  0x23   : > { %p730_p2 = pnand %p728_p0, %p714_p1  ;;  %p736_p4 = scmp.lt.s32.totalorder %s734_s24, %s727_s17 }
  0x25   : > { %p731_p12 = pneg %p730_p2  ;;  %p737_p5 = por %p736_p4, %p735_p11 }
  0x27   : > { %p738_p7 = pnand %p737_p5, %p731_p12 }
  0x29   : > { %741 = shalt.err (!%p738_p7)
}
  0x2a   : > { %s811_s25 = smov 128   ;;  %s812_s26 = smov 8  }
  0x2b   : > { %623 = dma.hbm_to_vmem [thread:$0]  (!%p896_p13), %s892_s28, 2048, %s900_s30, %s902_s4, %s811_s25, %s811_s25, %s812_s26  }
  0x2c   : > { %p606_p9 = scmp.ge.s32.totalorder %s808_s12, 1  ;;  %p132_p1 = scmp.lt.s32.totalorder %s808_s12, 3 }
  0x2e   : > { %p133_p3 = pnand %p606_p9, %p132_p1 }
  0x2f   : > { %s933_s27 = sand.u32 (!%p133_p3), 1, %s800_s10  }
  0x30   : > { %136 = sbr.rel (%p133_p3) target bundleno = 320 (0x140), region = 28  ;;  %s607_s29 = sshll.u32 (!%p133_p3), %s933_s27, 7 }
  0x31   : > { %s139_s5 = scalar_lea.sflag (!%p133_p3), [#allocation3], %s933_s27  ;;  %s937_s6 = scalar_lea.vmem (!%p133_p3), [#allocation2], %s607_s29 }
  0x37   : > { %787 = dma.done.wait (%p872_p6), %s139_s5, 2048  }
  0x38   : > { %789 = vsyncadd (%p872_p6), %s139_s5, 4294965248  ;;  %v944_v0 = vld [vmem:[%s937_s6 + $0x10] sm:$0xff]  ;;  %v609_v1 = vld [vmem:[%s1176_s1] ss:$0 sm:$0xff]  ;;  %s608_s20 = sshll.u32 %s933_s27, 3  ;;  %vm499_vm0 = vcmask 1041409  }
  0x39   : > { %v950_v2 = vld [vmem:[%s937_s6] sm:$0xff]  ;;  %v189_v3 = vmul.f32 %v609_v1, %v944_v0  ;;  %v955_v5 = vld [vmem:[%s937_s6 + $0x18] sm:$0xff]  ;;  %v958_v6 = vld [vmem:[%s937_s6 + $0x8] sm:$0xff]  ;;  %vm501_vm1 = vcmask 1042434   ;;  %vm503_vm2 = vcmask 1043459   ;;  %vm505_vm3 = vcmask 1044484  }
  0x3a   : > { %v187_v4 = vmul.f32 %v609_v1, %v950_v2  ;;  %v190_v7 = vmul.f32 %v609_v1, %v955_v5  ;;  %v188_v8 = vmul.f32 %v609_v1, %v958_v6  ;;  %v963_v9 = vld [vmem:[%s937_s6 + $0x28] sm:$0xff]  ;;  %v966_v10 = vld [vmem:[%s937_s6 + $0x20] sm:$0xff]  ;;  %v971_v13 = vld [vmem:[%s937_s6 + $0x38] sm:$0xff]  ;;  %vm507_vm4 = vcmask 1045509   ;;  %s611_s3 = sshll.u32 %s850_s13, 7  ;;  %s162_s4 = scalar_lea.vmem [#allocation5], %s608_s20 }
  0x3b   : > { %207 = vadd.xlane.f32.xlu1 %v189_v3  ;;  %v192_v11 = vmul.f32 %v609_v1, %v963_v9  ;;  %v191_v12 = vmul.f32 %v609_v1, %v966_v10  ;;  %v974_v14 = vld [vmem:[%s937_s6 + $0x30] sm:$0xff]  ;;  %v194_v15 = vmul.f32 %v609_v1, %v971_v13  ;;  %v979_v17 = vld [vmem:[%s937_s6 + $0x48] sm:$0xff]  ;;  %v982_v18 = vld [vmem:[%s937_s6 + $0x40] sm:$0xff]  ;;  %vm509_vm5 = vcmask 1046534   ;;  %s529_s7 = sshll.u32 %s162_s4, 4  ;;  %s1131_s16 = scalar_lea.hbm %s1177_s2, %s611_s3  ;;  %s1133_s7 = int_to_ptr.vmem [resolvable:$true] %s529_s7 }
  0x3c   : > { %203 = vadd.xlane.f32.xlu0 %v187_v4  ;;  %v193_v16 = vmul.f32 %v609_v1, %v974_v14  ;;  %v196_v19 = vmul.f32 %v609_v1, %v979_v17  ;;  %v195_v20 = vmul.f32 %v609_v1, %v982_v18  ;;  %v987_v21 = vld [vmem:[%s937_s6 + $0x58] sm:$0xff]  ;;  %v990_v22 = vld [vmem:[%s937_s6 + $0x50] sm:$0xff]  ;;  %v995_v25 = vld [vmem:[%s937_s6 + $0x68] sm:$0xff]  ;;  %vm511_vm6 = vcmask 1047559   ;;  %s516_s13 = scalar_lea.sflag [#allocation4], %s933_s27  ;;  %s742_s17 = scalar_lea.vmem %s1133_s7, 128 }
  0x3d   : > { %v198_v23 = vmul.f32 %v609_v1, %v987_v21  ;;  %v197_v24 = vmul.f32 %v609_v1, %v990_v22  ;;  %v998_v26 = vld [vmem:[%s937_s6 + $0x60] sm:$0xff]  ;;  %v200_v27 = vmul.f32 %v609_v1, %v995_v25  ;;  %v1003_v29 = vld [vmem:[%s937_s6 + $0x78] sm:$0xff]  ;;  %v1006_v30 = vld [vmem:[%s937_s6 + $0x70] sm:$0xff]  ;;  %p743_p6 = scmp.ne.s32.totalorder %s1133_s7, %s742_s17  ;;  %p1184_p11 = scmp.ne.s32.totalorder %s1181_s21, 0 }
  0x3e   : > { %v199_v28 = vmul.f32 %v609_v1, %v998_v26  ;;  %v202_v31 = vmul.f32 %v609_v1, %v1003_v29  ;;  %v201_v32 = vmul.f32 %v609_v1, %v1006_v30  ;;  %s813_s19 = smov [#allocation5]  }
  0x3f   : > { %209 = vadd.xlane.f32.xlu1 %v190_v7  ;;  %p744_p12 = pnand %p743_p6, %p1184_p11  ;;  %s746_s23 = sshll.u32 %s813_s19, 4  ;;  %s747_s23 = int_to_ptr.vmem [resolvable:$false] %s746_s23 }
  0x40   : > { %205 = vadd.xlane.f32.xlu0 %v188_v8  ;;  %s748_s24 = scalar_lea.vmem %s747_s23, 256  ;;  %p749_p8 = scmp.lt.s32.totalorder %s1133_s7, %s747_s23 }
  0x41   : > { %p745_p13 = pneg %p744_p12  ;;  %p750_p10 = scmp.lt.s32.totalorder %s748_s24, %s742_s17 }
  0x43   : > { %213 = vadd.xlane.f32.xlu1 %v192_v11  ;;  %p751_p0 = por %p750_p10, %p749_p8 }
  0x44   : > { %211 = vadd.xlane.f32.xlu0 %v191_v12 }
  0x45   : > { %p752_p2 = pnand %p751_p0, %p745_p13 }
  0x47   : > { %217 = vadd.xlane.f32.xlu1 %v194_v15 }
  0x48   : > { %215 = vadd.xlane.f32.xlu0 %v193_v16 }
  0x4b   : > { %221 = vadd.xlane.f32.xlu1 %v196_v19 }
  0x4c   : > { %219 = vadd.xlane.f32.xlu0 %v195_v20 }
  0x4f   : > { %225 = vadd.xlane.f32.xlu1 %v198_v23 }
  0x50   : > { %223 = vadd.xlane.f32.xlu0 %v197_v24 }
  0x53   : > { %229 = vadd.xlane.f32.xlu1 %v200_v27 }
  0x54   : > { %227 = vadd.xlane.f32.xlu0 %v199_v28 }
  0x57   : > { %233 = vadd.xlane.f32.xlu1 %v202_v31 }
  0x58   : > { %231 = vadd.xlane.f32.xlu0 %v201_v32 }
  0xc8   : > { %v208_v33 = vpop.xlane.xlu1 %207 }
  0xc9   : > { %v204_v34 = vpop.xlane.xlu0 %203 }
  0xcc   : > { %v210_v35 = vpop.xlane.xlu1 %209 }
  0xcd   : > { %v206_v36 = vpop.xlane.xlu0 %205  ;;  %v242_v37 = vmax.f32 %v208_v33, %v210_v35 }
  0xce   : > { %v235_v38 = vmax.f32 %v204_v34, %v206_v36 }
  0xcf   : > { %v243_v39 = vrot.slane %v242_v37, 4 }
  0xd0   : > { %v236_v40 = vrot.slane %v235_v38, 4  ;;  %v214_v41 = vpop.xlane.xlu1 %213 }
  0xd1   : > { %v212_v42 = vpop.xlane.xlu0 %211  ;;  %v244_v43 = vmax.f32 %v242_v37, %v243_v39 }
  0xd2   : > { %v237_v44 = vmax.f32 %v235_v38, %v236_v40  ;;  %v249_v45 = vmax.f32 %v212_v42, %v214_v41 }
  0xd3   : > { %v245_v46 = vrot.slane %v244_v43, 2 }
  0xd4   : > { %v238_v47 = vrot.slane %v237_v44, 2  ;;  %v250_v48 = vrot.slane %v249_v45, 4  ;;  %v1010_v49 = vpop.xlane.xlu1 %217 }
  0xd5   : > { %v216_v50 = vpop.xlane.xlu0 %215  ;;  %v246_v51 = vmax.f32 %v244_v43, %v245_v46 }
  0xd6   : > { %v239_v52 = vmax.f32 %v237_v44, %v238_v47  ;;  %v251_v53 = vmax.f32 %v249_v45, %v250_v48  ;;  %v256_v54 = vmax.f32 %v216_v50, %v1010_v49 }
  0xd7   : > { %v247_v55 = vrot.slane %v246_v51, 1 }
  0xd8   : > { %v240_v56 = vrot.slane %v239_v52, 1  ;;  %v252_v57 = vrot.slane %v251_v53, 2  ;;  %v257_v58 = vrot.slane %v256_v54, 4  ;;  %v1013_v59 = vpop.xlane.xlu1 %221 }
  0xd9   : > { %v1015_v60 = vpop.xlane.xlu0 %219  ;;  %v248_v61 = vmax.f32 %v246_v51, %v247_v55 }
  0xda   : > { %v241_v62 = vmax.f32 %v239_v52, %v240_v56  ;;  %v253_v63 = vmax.f32 %v251_v53, %v252_v57  ;;  %v258_v1 = vmax.f32 %v256_v54, %v257_v58  ;;  %v263_v3 = vmax.f32 %v1015_v60, %v1013_v59 }
  0xdb   : > { %v293_v4 = vsub.f32 %v208_v33, %v248_v61  ;;  %v294_v7 = vsub.f32 %v210_v35, %v248_v61 }
  0xdc   : > { %v291_v8 = vsub.f32 %v204_v34, %v241_v62  ;;  %v292_v11 = vsub.f32 %v206_v36, %v241_v62  ;;  %v254_v12 = vrot.slane %v253_v63, 1  ;;  %v259_v15 = vrot.slane %v258_v1, 2  ;;  %v1019_v19 = vpop.xlane.xlu1 %225 }
  0xdd   : > { %v264_v16 = vrot.slane %v263_v3, 4  ;;  %v1021_v20 = vpop.xlane.xlu0 %223  ;;  %v311_v23 = vmul.f32 1.442695, %v293_v4  ;;  %v313_v24 = vmul.f32 1.442695, %v294_v7 }
  0xde   : > { %v307_v27 = vmul.f32 1.442695, %v291_v8  ;;  %v270_v28 = vmax.f32 %v1021_v20, %v1019_v19  ;;  %v309_v31 = vmul.f32 1.442695, %v292_v11  ;;  %v255_v32 = vmax.f32 %v253_v63, %v254_v12 }
  0xdf   : > { %v260_v37 = vmax.f32 %v258_v1, %v259_v15  ;;  %v265_v33 = vmax.f32 %v263_v3, %v264_v16  ;;  %664 = vpow2.f32 %v311_v23 }
  0xe0   : > { %v271_v34 = vrot.slane %v270_v28, 4  ;;  %666 = vpow2.f32 %v313_v24  ;;  %v295_v35 = vsub.f32 %v212_v42, %v255_v32  ;;  %v296_v36 = vsub.f32 %v214_v41, %v255_v32  ;;  %v1025_v39 = vpop.xlane.xlu1 %229 }
  0xe1   : > { %v261_v38 = vrot.slane %v260_v37, 1  ;;  %v1027_v40 = vpop.xlane.xlu0 %227  ;;  %668 = vpow2.f32 %v307_v27  ;;  %v266_v43 = vrot.slane %v265_v33, 2 }
  0xe2   : > { %v272_v44 = vmax.f32 %v270_v28, %v271_v34  ;;  %v277_v45 = vmax.f32 %v1027_v40, %v1025_v39  ;;  %670 = vpow2.f32 %v309_v31  ;;  %v315_v46 = vmul.f32 1.442695, %v295_v35 }
  0xe3   : > { %v317_v47 = vmul.f32 1.442695, %v296_v36  ;;  %v262_v48 = vmax.f32 %v260_v37, %v261_v38  ;;  %v267_v51 = vmax.f32 %v265_v33, %v266_v43 }
  0xe4   : > { %v273_v52 = vrot.slane %v272_v44, 2  ;;  %v278_v53 = vrot.slane %v277_v45, 4  ;;  %672 = vpow2.f32 %v315_v46  ;;  %v1032_v54 = vpop.xlane.xlu1 %233 }
  0xe5   : > { %v297_v41 = vsub.f32 %v216_v50, %v262_v48  ;;  %v298_v42 = vsub.f32 %v1010_v49, %v262_v48  ;;  %v1034_v55 = vpop.xlane.xlu0 %231  ;;  %674 = vpow2.f32 %v317_v47  ;;  %v268_v56 = vrot.slane %v267_v51, 1 }
  0xe6   : > { %v274_v57 = vmax.f32 %v272_v44, %v273_v52  ;;  %v279_v58 = vmax.f32 %v277_v45, %v278_v53  ;;  %v284_v63 = vmax.f32 %v1034_v55, %v1032_v54 }
  0xe7   : > { %v319_v61 = vmul.f32 1.442695, %v297_v41  ;;  %v321_v62 = vmul.f32 1.442695, %v298_v42  ;;  %v269_v1 = vmax.f32 %v267_v51, %v268_v56 }
  0xe8   : > { %v275_v3 = vrot.slane %v274_v57, 1  ;;  %v280_v4 = vrot.slane %v279_v58, 2  ;;  %v285_v50 = vrot.slane %v284_v63, 4 }
  0xe9   : > { %676 = vpow2.f32 %v319_v61  ;;  %v1038_v7 = vpop.eup %664  ;;  %v299_v49 = vsub.f32 %v1015_v60, %v269_v1  ;;  %v300_v8 = vsub.f32 %v1013_v59, %v269_v1 }
  0xea   : > { %678 = vpow2.f32 %v321_v62  ;;  %v276_v11 = vmax.f32 %v274_v57, %v275_v3  ;;  %v1042_v12 = vpop.eup %666  ;;  %v281_v15 = vmax.f32 %v279_v58, %v280_v4  ;;  %v286_v16 = vmax.f32 %v284_v63, %v285_v50 }
  0xeb   : > { %v1044_v23 = vpop.eup %668  ;;  %v346_v24 = vadd.f32 %v1042_v12, %v1038_v7  ;;  %v323_v27 = vmul.f32 1.442695, %v299_v49  ;;  %v325_v28 = vmul.f32 1.442695, %v300_v8 }
  0xec   : > { %v301_v31 = vsub.f32 %v1021_v20, %v276_v11  ;;  %v1049_v32 = vpop.eup %670  ;;  %v302_v60 = vsub.f32 %v1019_v19, %v276_v11  ;;  %v282_v37 = vrot.slane %v281_v15, 1  ;;  %v287_v59 = vrot.slane %v286_v16, 2 }
  0xed   : > { %v347_v33 = vrot.slane %v346_v24, 4  ;;  %v339_v34 = vadd.f32 %v1049_v32, %v1044_v23  ;;  %680 = vpow2.f32 %v323_v27 }
  0xee   : > { %v327_v35 = vmul.f32 1.442695, %v301_v31  ;;  %v1054_v36 = vpop.eup %672  ;;  %682 = vpow2.f32 %v325_v28  ;;  %v329_v38 = vmul.f32 1.442695, %v302_v60  ;;  %v283_v43 = vmax.f32 %v281_v15, %v282_v37 }
  0xef   : > { %v288_v44 = vmax.f32 %v286_v16, %v287_v59  ;;  %v1056_v45 = vpop.eup %674  ;;  %v348_v20 = vadd.f32 %v347_v33, %v346_v24  ;;  %v340_v46 = vrot.slane %v339_v34, 4 }
  0xf0   : > { %684 = vpow2.f32 %v327_v35  ;;  %v353_v19 = vadd.f32 %v1056_v45, %v1054_v36  ;;  %v303_v47 = vsub.f32 %v1027_v40, %v283_v43  ;;  %v304_v48 = vsub.f32 %v1025_v39, %v283_v43 }
  0xf1   : > { %686 = vpow2.f32 %v329_v38  ;;  %v349_v51 = vrot.slane %v348_v20, 2  ;;  %v341_v52 = vadd.f32 %v340_v46, %v339_v34  ;;  %v289_v53 = vrot.slane %v288_v44, 1 }
  0xf2   : > { %v354_v42 = vrot.slane %v353_v19, 4  ;;  %v331_v56 = vmul.f32 1.442695, %v303_v47  ;;  %v333_v57 = vmul.f32 1.442695, %v304_v48 }
  0xf3   : > { %v1062_v41 = vpop.eup %676  ;;  %v350_v61 = vadd.f32 %v349_v51, %v348_v20  ;;  %v342_v62 = vrot.slane %v341_v52, 2  ;;  %v290_v63 = vmax.f32 %v288_v44, %v289_v53 }
  0xf4   : > { %v1064_v58 = vpop.eup %678  ;;  %v355_v1 = vadd.f32 %v354_v42, %v353_v19  ;;  %688 = vpow2.f32 %v331_v56 }
  0xf5   : > { %v360_v3 = vadd.f32 %v1064_v58, %v1062_v41  ;;  %v351_v40 = vrot.slane %v350_v61, 1  ;;  %v343_v39 = vadd.f32 %v342_v62, %v341_v52  ;;  %690 = vpow2.f32 %v333_v57 }
  0xf6   : > { %v305_v4 = vsub.f32 %v1034_v55, %v290_v63  ;;  %v356_v50 = vrot.slane %v355_v1, 2  ;;  %v306_v8 = vsub.f32 %v1032_v54, %v290_v63 }
  0xf7   : > { %v361_v49 = vrot.slane %v360_v3, 4  ;;  %v1070_v11 = vpop.eup %680  ;;  %v344_v15 = vrot.slane %v343_v39, 1  ;;  %v352_v37 = vadd.f32 %v351_v40, %v350_v61 }
  0xf8   : > { %v335_v16 = vmul.f32 1.442695, %v305_v4  ;;  %v1072_v24 = vpop.eup %682  ;;  %v357_v27 = vadd.f32 %v356_v50, %v355_v1  ;;  %v337_v31 = vmul.f32 1.442695, %v306_v8 }
  0xf9   : > { %v362_v28 = vadd.f32 %v361_v49, %v360_v3  ;;  %v367_v59 = vadd.f32 %v1072_v24, %v1070_v11  ;;  %v345_v33 = vadd.f32 %v344_v15, %v343_v39 }
  0xfa   : > { %v1074_v60 = vpop.eup %684  ;;  %v358_v34 = vrot.slane %v357_v27, 1  ;;  %692 = vpow2.f32 %v335_v16 }
  0xfb   : > { %v1078_v55 = vpop.eup %686  ;;  %v363_v54 = vrot.slane %v362_v28, 2  ;;  %v368_v35 = vrot.slane %v367_v59, 4  ;;  %694 = vpow2.f32 %v337_v31 }
  0xfc   : > { %v374_v38 = vadd.f32 %v1078_v55, %v1074_v60  ;;  %v359_v43 = vadd.f32 %v358_v34, %v357_v27  ;;  %696 = vrcp.f32 %v352_v37 }
  0xfd   : > { %v364_v44 = vadd.f32 %v363_v54, %v362_v28  ;;  %v369_v20 = vadd.f32 %v368_v35, %v367_v59  ;;  %698 = vrcp.f32 %v345_v33 }
  0xfe   : > { %v375_v46 = vrot.slane %v374_v38, 4  ;;  %v1082_v19 = vpop.eup %688  ;;  %700 = vrcp.f32 %v359_v43 }
  0xff   : > { %v365_v47 = vrot.slane %v364_v44, 1  ;;  %v1084_v48 = vpop.eup %690  ;;  %v370_v51 = vrot.slane %v369_v20, 2 }
 0x100   : > { %v376_v52 = vadd.f32 %v375_v46, %v374_v38  ;;  %v381_v42 = vadd.f32 %v1084_v48, %v1082_v19 }
 0x101   : > { %v366_v53 = vadd.f32 %v365_v47, %v364_v44  ;;  %v371_v56 = vadd.f32 %v370_v51, %v369_v20 }
 0x102   : > { %v377_v57 = vrot.slane %v376_v52, 2  ;;  %v382_v61 = vrot.slane %v381_v42, 4 }
 0x103   : > { %702 = vrcp.f32 %v366_v53  ;;  %v372_v62 = vrot.slane %v371_v56, 1 }
 0x104   : > { %v378_v63 = vadd.f32 %v377_v57, %v376_v52  ;;  %v1088_v1 = vpop.eup %692  ;;  %v383_v3 = vadd.f32 %v382_v61, %v381_v42 }
 0x105   : > { %v373_v40 = vadd.f32 %v372_v62, %v371_v56  ;;  %v1090_v4 = vpop.eup %694 }
 0x106   : > { %v379_v39 = vrot.slane %v378_v63, 1  ;;  %v697_v50 = vpop.eup %696  ;;  %v384_v8 = vrot.slane %v383_v3, 2  ;;  %v388_v15 = vadd.f32 %v1090_v4, %v1088_v1 }
 0x107   : > { %704 = vrcp.f32 %v373_v40  ;;  %v699_v16 = vpop.eup %698  ;;  %v399_v31 = vmul.f32 %v697_v50, %v1038_v7  ;;  %v400_v37 = vmul.f32 %v697_v50, %v1042_v12 }
 0x108   : > { %v380_v49 = vadd.f32 %v379_v39, %v378_v63  ;;  %v701_v27 = vpop.eup %700  ;;  %v385_v28 = vadd.f32 %v384_v8, %v383_v3  ;;  %v389_v59 = vrot.slane %v388_v15, 4  ;;  %v396_v33 = vmul.f32 %v699_v16, %v1044_v23 }
 0x109   : > { %v397_v34 = vmul.f32 %v699_v16, %v1049_v32  ;;  %v402_v38 = vmul.f32 %v701_v27, %v1054_v36  ;;  %v403_v43 = vmul.f32 %v701_v27, %v1056_v45  ;;  %v421_v7 = vmul.f32 %v399_v31, %v944_v0 }
 0x10a   : > { %706 = vrcp.f32 %v380_v49  ;;  %v386_v54 = vrot.slane %v385_v28, 1  ;;  %v390_v44 = vadd.f32 %v389_v59, %v388_v15  ;;  %v422_v12 = vmul.f32 %v400_v37, %v955_v5 }
 0x10b   : > { %v419_v23 = vmul.f32 %v396_v33, %v950_v2  ;;  %v420_v32 = vmul.f32 %v397_v34, %v958_v6  ;;  %v423_v36 = vmul.f32 %v402_v38, %v966_v10  ;;  %v424_v45 = vmul.f32 %v403_v43, %v963_v9 }
 0x10c   : > { %v387_v47 = vadd.f32 %v386_v54, %v385_v28  ;;  %v391_v51 = vrot.slane %v390_v44, 2  ;;  %v442_v42 = vadd.f32 %v422_v12, %v421_v7 }
 0x10d   : > { %v703_v35 = vpop.eup %702  ;;  %v435_v2 = vadd.f32 %v420_v32, %v419_v23  ;;  %v449_v6 = vadd.f32 %v424_v45, %v423_v36 }
 0x10e   : > { %v405_v20 = vmul.f32 %v703_v35, %v1062_v41  ;;  %v406_v46 = vmul.f32 %v703_v35, %v1064_v58  ;;  %708 = vrcp.f32 %v387_v47  ;;  %v392_v52 = vadd.f32 %v391_v51, %v390_v44 }
 0x10f   : > { %v443_v63 = vrot.slane %v442_v42, 4  ;;  %v436_v40 = vrot.slane %v435_v2, 4  ;;  %v450_v39 = vrot.slane %v449_v6, 4 }
 0x110   : > { %v425_v41 = vmul.f32 %v405_v20, %v974_v14  ;;  %v426_v58 = vmul.f32 %v406_v46, %v971_v13  ;;  %v393_v57 = vrot.slane %v392_v52, 1 }
 0x111   : > { %v705_v53 = vpop.eup %704  ;;  %v444_v8 = vadd.f32 %v443_v63, %v442_v42  ;;  %v451_v27 = vadd.f32 %v450_v39, %v449_v6 }
 0x112   : > { %v408_v0 = vmul.f32 %v705_v53, %v1070_v11  ;;  %v409_v5 = vmul.f32 %v705_v53, %v1072_v24  ;;  %v456_v9 = vadd.f32 %v426_v58, %v425_v41  ;;  %v394_v3 = vadd.f32 %v393_v57, %v392_v52 }
 0x113   : > { %v452_v54 = vrot.slane %v451_v27, 2 }
 0x114   : > { %v707_v56 = vpop.eup %706  ;;  %v427_v61 = vmul.f32 %v408_v0, %v982_v18  ;;  %v428_v10 = vmul.f32 %v409_v5, %v979_v17  ;;  %710 = vrcp.f32 %v394_v3  ;;  %v457_v49 = vrot.slane %v456_v9, 4 }
 0x115   : > { %v411_v62 = vmul.f32 %v707_v56, %v1074_v60  ;;  %v412_v14 = vmul.f32 %v707_v56, %v1078_v55  ;;  %v437_v55 = vadd.f32 %v436_v40, %v435_v2 }
 0x116   : > { %v463_v13 = vadd.f32 %v428_v10, %v427_v61  ;;  %v458_v31 = vadd.f32 %v457_v49, %v456_v9 }
 0x117   : > { %v429_v11 = vmul.f32 %v411_v62, %v990_v22  ;;  %v430_v24 = vmul.f32 %v412_v14, %v987_v21  ;;  %v445_v21 = vrot.slane %v444_v8, 2  ;;  %v438_v33 = vrot.slane %v437_v55, 2 }
 0x118   : > { %v709_v50 = vpop.eup %708  ;;  %v464_v17 = vrot.slane %v463_v13, 4  ;;  %v459_v38 = vrot.slane %v458_v31, 2 }
 0x119   : > { %v470_v18 = vadd.f32 %v430_v24, %v429_v11  ;;  %v414_v15 = vmul.f32 %v709_v50, %v1082_v19  ;;  %v415_v60 = vmul.f32 %v709_v50, %v1084_v48  ;;  %v446_v19 = vadd.f32 %v445_v21, %v444_v8 }
 0x11a   : > { %v465_v37 = vadd.f32 %v464_v17, %v463_v13  ;;  %v439_v20 = vadd.f32 %v438_v33, %v437_v55  ;;  %v460_v12 = vadd.f32 %v459_v38, %v458_v31 }
 0x11b   : > { %v471_v16 = vrot.slane %v470_v18, 4  ;;  %v431_v28 = vmul.f32 %v414_v15, %v998_v26  ;;  %v432_v22 = vmul.f32 %v415_v60, %v995_v25  ;;  %v453_v25 = vadd.f32 %v452_v54, %v451_v27 }
 0x11c   : > { %v466_v44 = vrot.slane %v465_v37, 2  ;;  %v447_v36 = vrot.slane %v446_v19, 1  ;;  %v440_v45 = vrot.slane %v439_v20, 1  ;;  %v461_v42 = vrot.slane %v460_v12, 1 }
 0x11d   : > { %v477_v59 = vadd.f32 %v432_v22, %v431_v28  ;;  %v472_v34 = vadd.f32 %v471_v16, %v470_v18  ;;  %v454_v41 = vrot.slane %v453_v25, 1 }
 0x11e   : > { %v711_v43 = vpop.eup %710  ;;  %v467_v32 = vadd.f32 %v466_v44, %v465_v37  ;;  %v441_v5 = vadd.f32 %v440_v45, %v439_v20 }
 0x11f   : > { %v478_v35 = vrot.slane %v477_v59, 4  ;;  %v417_v46 = vmul.f32 %v711_v43, %v1088_v1  ;;  %v418_v26 = vmul.f32 %v711_v43, %v1090_v4  ;;  %v473_v47 = vrot.slane %v472_v34, 2 }
 0x120   : > { %v468_v0 = vrot.slane %v467_v32, 1  ;;  %v448_v4 = vadd.f32 %v447_v36, %v446_v19  ;;  %v455_v57 = vadd.f32 %v454_v41, %v453_v25 }
 0x121   : > { %v479_v48 = vadd.f32 %v478_v35, %v477_v59  ;;  %v433_v51 = vmul.f32 %v417_v46, %v1006_v30  ;;  %v434_v23 = vmul.f32 %v418_v26, %v1003_v29  ;;  %v474_v53 = vadd.f32 %v473_v47, %v472_v34 }
 0x122   : > { %v462_v29 = vadd.f32 %v461_v42, %v460_v12  ;;  %v469_v61 = vadd.f32 %v468_v0, %v467_v32  ;;  %v500_v62 = vsel %vm499_vm0, %v448_v4, %v441_v5 }
 0x123   : > { %v480_v7 = vrot.slane %v479_v48, 2  ;;  %v484_v52 = vadd.f32 %v434_v23, %v433_v51  ;;  %v475_v56 = vrot.slane %v474_v53, 1  ;;  %v502_v63 = vsel %vm501_vm1, %v455_v57, %v500_v62 }
 0x124   : > { %v504_v3 = vsel %vm503_vm2, %v462_v29, %v502_v63 }
 0x125   : > { %v481_v58 = vadd.f32 %v480_v7, %v479_v48  ;;  %v485_v1 = vrot.slane %v484_v52, 4  ;;  %v476_v10 = vadd.f32 %v475_v56, %v474_v53  ;;  %v506_v40 = vsel %vm505_vm3, %v469_v61, %v504_v3 }
 0x127   : > { %v486_v2 = vadd.f32 %v485_v1, %v484_v52  ;;  %v482_v6 = vrot.slane %v481_v58, 1  ;;  %v508_v24 = vsel %vm507_vm4, %v476_v10, %v506_v40 }
 0x129   : > { %v487_v30 = vrot.slane %v486_v2, 2  ;;  %v483_v14 = vadd.f32 %v482_v6, %v481_v58 }
 0x12b   : > { %v488_v9 = vadd.f32 %v487_v30, %v486_v2  ;;  %v510_v39 = vsel %vm509_vm5, %v483_v14, %v508_v24 }
 0x12d   : > { %v489_v13 = vrot.slane %v488_v9, 1 }
 0x12f   : > { %v490_v11 = vadd.f32 %v489_v13, %v488_v9 }
 0x131   : > { %v512_v50 = vsel %vm511_vm6, %v490_v11, %v510_v39 }
 0x132   : > { %514 = vst [vmem:[%s162_s4] sm:$0xff] %v512_v50 }
 0x133   : > { %755 = shalt.err (!%p752_p2)
}
 0x134   : > { %s756_s25 = scalar_lea.hbm %s1131_s16, 128  ;;  %s760_s29 = scalar_lea.hbm %s1177_s2, 256 }
 0x135   : > { %p757_p4 = scmp.ne.s32.totalorder %s1131_s16, %s756_s25  ;;  %p761_p9 = scmp.lt.u32.totalorder %s1131_s16, %s1177_s2 }
 0x136   : > { %p762_p1 = scmp.lt.u32.totalorder %s760_s29, %s756_s25  ;;  %p764_p6 = scmp.lt.u32.totalorder %s756_s25, %s1131_s16 }
 0x137   : > { %p758_p5 = pnand %p757_p4, %p1184_p11 }
 0x138   : > { %p763_p3 = por %p762_p1, %p761_p9 }
 0x139   : > { %p759_p7 = pneg %p758_p5 }
 0x13a   : > { %p765_p12 = por %p764_p6, %p763_p3 }
 0x13c   : > { %p766_p13 = pnand %p765_p12, %p759_p7 }
 0x13e   : > { %769 = shalt.err (!%p766_p13)
}
 0x13f   : > { %618 = dma.vmem_to_hbm [thread:$0]  (%p1184_p11), %s1133_s7, 128, %s1131_s16, %s516_s13  }
 0x140 PF: > { %s541_s28 = sand.u32 1, %s796_s9   ;;  %p1185_p8 = scmp.ne.s32.totalorder %s1182_s22, 0 }
 0x141   : > { %p1186_p10 = scmp.ge.s32.totalorder %s808_s12, 2  ;;  %s542_s30 = scalar_lea.sflag [#allocation4], %s541_s28 }
 0x143   : > { %p625_p0 = pnand %p1186_p10, %p1185_p8 }
 0x145   : > { %791 = dma.done.wait (!%p625_p0), %s542_s30, 128  }
 0x146   : > { %793 = vsyncadd (!%p625_p0), %s542_s30, 4294967168  ;;  %p15_p2 = scmp.ge.s32.totalorder %s854_s15, 4   ;;  %s1187_s9 = smov %s800_s10 }
 0x147   : > { %s1188_s10 = smov %s804_s11  ;;  %s1189_s11 = smov %s866_s18 }
 0x148   : > { %s1190_s12 = smov %s854_s15  ;;  %17 = sbr.rel (!%p15_p2) target bundleno = 5 (0x5), region = 73 }
 0x14f   :  { %547 = vsyncpa [#allocation3], 1 }
 0x150   :  { %549 = vsyncpa [#allocation3 + $0x1], 1 }
 0x151   :  { %550 = vsyncpa [#allocation4], 1 }
 0x152   :  { %552 = vsyncpa [#allocation4 + $0x1], 1 }

</bundles_post_ra>
